<compile_context>
chip_gen: v6e
topology: v6e:2x2x1
jax: 0.10.0
libtpu: 0.0.40
codegen_flags: <defaults>
</compile_context>

<pallas_src>
import functools

import jax
import jax.numpy as jnp
from jax.experimental import pallas as pl
from jax.experimental.pallas import tpu as pltpu

EPS = 1e-5


def _residual_block_kernel(x_ref, mask_ref, w1_ref, b1_ref, w2_ref, b2_ref,
                           o_ref, patches_ref, *, Wp, HW):
    """One batch element.

    x_ref:      (1, C, P)  flattened zero-padded image (zeros on border & tail)
    mask_ref:   (1, P)     1.0 at valid interior coords, else 0.0
    w*_ref:     (C, 9*C)   conv weights, tap-major / cin-minor row layout
    b*_ref:     (C, 1)
    o_ref:      (1, C, P)  result in the same flattened padded coords
    patches_ref:(9*C, P)   VMEM scratch for the im2col stack (fully rewritten
                            before every use -> no init needed)
    """
    C = x_ref.shape[1]
    P = x_ref.shape[2]
    inv_hw = 1.0 / float(HW)

    ext = x_ref[0]            # (C, P) padded image, zeros on border & tail
    mask = mask_ref[...]      # (1, P), hoisted once

    def conv3x3(buf, w_row_ref, b_ref):
        # Build the (9C, P) im2col stack with 9 static lane rotations, then
        # contract all taps/channels in a single MXU matmul.
        for dh in range(3):
            for dw in range(3):
                t = 3 * dh + dw
                s = (dh - 1) * Wp + (dw - 1)          # flat-coord shift of this tap
                sh = (-s) % P                          # out[p] = buf[p + s]
                rolled = buf if sh == 0 else pltpu.roll(buf, shift=sh, axis=1)
                patches_ref[t * C:(t + 1) * C, :] = rolled
        y = jnp.dot(w_row_ref[...], patches_ref[...],
                    preferred_element_type=jnp.float32)   # (C, P)
        return y + b_ref[...]                              # (C, 1) lane-broadcast

    def inst_norm(y, relu):
        # PyTorch InstanceNorm2d(affine=False): biased variance, eps in rsqrt.
        # Statistics taken over exactly the H*W valid positions via the mask.
        mean = jnp.sum(y * mask, axis=1, keepdims=True) * inv_hw
        cen = y - mean
        var = jnp.sum(cen * cen * mask, axis=1, keepdims=True) * inv_hw
        yn = cen * jax.lax.rsqrt(var + EPS)                 # EUP slot
        if relu:
            yn = jnp.maximum(yn, 0.0)
        # Zero the padded-border/tail garbage: this IS the zero-padding for
        # the next conv, so no re-padding pass is needed.
        return yn * mask

    y1 = inst_norm(conv3x3(ext, w1_ref, b1_ref), relu=True)    # (C, P)
    y2 = inst_norm(conv3x3(y1, w2_ref, b2_ref), relu=False)    # (C, P)

    # Residual add: ext is zero exactly where y2 is zero, so the sum is the
    # correct result at interior coords and zero elsewhere. Lane-dense store.
    o_ref[0] = (y2 + ext).astype(o_ref.dtype)


def residual_block(x_nchw, w1, b1, w2, b2):
    """x_nchw: (N, C, H, W) f32; w*: (C, C, 3, 3); b*: (C,). Returns (N, C, H, W)."""
    N, C, H, W = x_nchw.shape
    Hp, Wp = H + 2, W + 2
    Q = Hp * Wp                          # flattened padded spatial size
    P = ((Q + 127) // 128) * 128         # lane-aligned buffer width

    # Single input buffer: flattened zero-padded image + zero tail (no
    # duplicate padded/unpadded copies in HBM).
    x = x_nchw.astype(jnp.float32)
    xpad = jnp.pad(x, ((0, 0), (0, 0), (1, 1), (1, 1)))            # (N,C,Hp,Wp)
    x_flat = jnp.pad(xpad.reshape(N, C, Q), ((0, 0), (0, 0), (0, P - Q)))

    # Valid-interior mask in flattened padded coordinates.
    p = jnp.arange(P)
    rows, cols = p // Wp, p % Wp
    mask = ((p < Q) & (rows >= 1) & (rows <= H) & (cols >= 1) & (cols <= W))
    mask = mask.astype(jnp.float32).reshape(1, P)

    # (Cout, Cin, kh, kw) -> (Cout, kh, kw, Cin) -> (Cout, 9*Cin): one matmul/conv.
    w1_row = jnp.transpose(w1, (0, 2, 3, 1)).reshape(C, 9 * C).astype(jnp.float32)
    w2_row = jnp.transpose(w2, (0, 2, 3, 1)).reshape(C, 9 * C).astype(jnp.float32)
    b1_c = b1.reshape(C, 1).astype(jnp.float32)
    b2_c = b2.reshape(C, 1).astype(jnp.float32)

    kernel = functools.partial(_residual_block_kernel, Wp=Wp, HW=H * W)

    out_flat = pl.pallas_call(
        kernel,
        out_shape=jax.ShapeDtypeStruct((N, C, P), jnp.float32),
        grid=(N,),
        in_specs=[
            pl.BlockSpec((1, C, P), lambda n: (n, 0, 0)),   # flattened padded image
            pl.BlockSpec((1, P), lambda n: (0, 0)),         # interior mask
            pl.BlockSpec((C, 9 * C), lambda n: (0, 0)),     # conv1 weights (row form)
            pl.BlockSpec((C, 1), lambda n: (0, 0)),         # conv1 bias
            pl.BlockSpec((C, 9 * C), lambda n: (0, 0)),     # conv2 weights
            pl.BlockSpec((C, 1), lambda n: (0, 0)),         # conv2 bias
        ],
        out_specs=pl.BlockSpec((1, C, P), lambda n: (n, 0, 0)),
        scratch_shapes=[pltpu.VMEM((9 * C, P), jnp.float32)],   # im2col stack
        compiler_params=pltpu.CompilerParams(
            # Batch elements are independent -> sharded across the two
            # TensorCores on v7x; harmless on v5e/v6e.
            dimension_semantics=("parallel",)),
        # TODO(synk): for production shapes (large C/H/W) add spatial tiling over
        # H (grid=(N, H//th) with a 1-row halo), bf16 MXU inputs, and an explicit
        # vmem_limit_bytes for v7x (64 MiB) / v5e (16 MiB scoped default).
    )(x_flat, mask, w1_row, b1_c, w2_row, b2_c)

    # Flat padded coords -> NCHW interior (pure layout plumbing in XLA).
    return out_flat[:, :, :Q].reshape(N, C, Hp, Wp)[:, :, 1:H + 1, 1:W + 1]


def _reference(x, w1, b1, w2, b2):
    """Pure-JAX reference matching the PyTorch ResidualBlock forward."""
    def conv(z, w, b):
        y = jax.lax.conv_general_dilated(
            z, w, window_strides=(1, 1), padding="SAME",
            dimension_numbers=("NCHW", "OIHW", "NCHW"))
        return y + b.reshape(1, -1, 1, 1)

    def inorm(y):
        mean = jnp.mean(y, axis=(2, 3), keepdims=True)
        var = jnp.mean((y - mean) ** 2, axis=(2, 3), keepdims=True)
        return (y - mean) * jax.lax.rsqrt(var + EPS)

    y = jnp.maximum(inorm(conv(x, w1, b1)), 0.0)
    y = inorm(conv(y, w2, b2))
    return y + x


if __name__ == "__main__":
    key = jax.random.PRNGKey(0)
    N, C, H, W = 2, 4, 16, 16
    k_x, k_w1, k_b1, k_w2, k_b2 = jax.random.split(key, 5)

    x = jax.random.normal(k_x, (N, C, H, W), jnp.float32)

    # Deterministic Kaiming-uniform-like init (nn.Conv2d parameter shapes).
    fan_in = C * 3 * 3
    bound = 1.0 / (fan_in ** 0.5)
    w1 = jax.random.uniform(k_w1, (C, C, 3, 3), jnp.float32, -bound, bound)
    b1 = jax.random.uniform(k_b1, (C,), jnp.float32, -bound, bound)
    w2 = jax.random.uniform(k_w2, (C, C, 3, 3), jnp.float32, -bound, bound)
    b2 = jax.random.uniform(k_b2, (C,), jnp.float32, -bound, bound)

    out = jax.jit(residual_block)(x, w1, b1, w2, b2)
    jax.block_until_ready(out)
    assert out.shape == (N, C, H, W) and out.dtype == jnp.float32

    ref = _reference(x, w1, b1, w2, b2)
    err = float(jnp.max(jnp.abs(out - ref)))
    assert err < 5e-2, f"kernel mismatch vs reference: max abs err = {err}"

    print("KERNEL_OK")
</pallas_src>

<mosaic_0001>
module attributes {stable_mosaic.version = 11 : i64} {
  func.func @_residual_block_kernel(%arg0: i32, %arg1: memref<1x4x384xf32, #tpu.memory_space<vmem>>, %arg2: memref<1x384xf32, #tpu.memory_space<vmem>>, %arg3: memref<4x36xf32, #tpu.memory_space<vmem>>, %arg4: memref<4x1xf32, #tpu.memory_space<vmem>>, %arg5: memref<4x36xf32, #tpu.memory_space<vmem>>, %arg6: memref<4x1xf32, #tpu.memory_space<vmem>>, %arg7: memref<1x4x384xf32, #tpu.memory_space<vmem>>, %arg8: memref<36x384xf32, #tpu.memory_space<vmem>>) attributes {dimension_semantics = [#tpu.dimension_semantics<parallel>], iteration_bounds = array<i64: 2>, scalar_prefetch = 0 : i64, scratch_operands = 1 : i64, tpu.core_type = #tpu.core_type<tc>, window_params = [{transform_indices = @transform_0, window_bounds = array<i64: 1, 4, 384>}, {pipeline_mode = #tpu.pipeline_mode<synchronous>, transform_indices = @transform_1, window_bounds = array<i64: 1, 384>}, {pipeline_mode = #tpu.pipeline_mode<synchronous>, transform_indices = @transform_2, window_bounds = array<i64: 4, 36>}, {pipeline_mode = #tpu.pipeline_mode<synchronous>, transform_indices = @transform_3, window_bounds = array<i64: 4, 1>}, {pipeline_mode = #tpu.pipeline_mode<synchronous>, transform_indices = @transform_4, window_bounds = array<i64: 4, 36>}, {pipeline_mode = #tpu.pipeline_mode<synchronous>, transform_indices = @transform_5, window_bounds = array<i64: 4, 1>}, {transform_indices = @transform_6, window_bounds = array<i64: 1, 4, 384>}]} {
    %c0 = arith.constant 0 : index
    %c0_0 = arith.constant 0 : index
    %c0_1 = arith.constant 0 : index
    %0 = vector.load %arg1[%c0, %c0_0, %c0_1] : memref<1x4x384xf32, #tpu.memory_space<vmem>>, vector<1x4x384xf32>
    %1 = vector.shape_cast %0 : vector<1x4x384xf32> to vector<4x384xf32>
    %c0_2 = arith.constant 0 : index
    %c0_3 = arith.constant 0 : index
    %2 = vector.load %arg2[%c0_2, %c0_3] : memref<1x384xf32, #tpu.memory_space<vmem>>, vector<1x384xf32>
    %c19_i32 = arith.constant 19 : i32
    %3 = tpu.dynamic_rotate %1 by %c19_i32 dim 1 : vector<4x384xf32>, i32 -> vector<4x384xf32>
    %c0_4 = arith.constant 0 : index
    %c0_5 = arith.constant 0 : index
    %4 = vector.load %arg8[%c0_4, %c0_5] : memref<36x384xf32, #tpu.memory_space<vmem>>, vector<4x384xf32>
    tpu.vector_store %arg8[%c0_4, %c0_5], %3 {strides = array<i32>} : memref<36x384xf32, #tpu.memory_space<vmem>>, vector<4x384xf32>,
    %c18_i32 = arith.constant 18 : i32
    %5 = tpu.dynamic_rotate %1 by %c18_i32 dim 1 : vector<4x384xf32>, i32 -> vector<4x384xf32>
    %c4 = arith.constant 4 : index
    %c0_6 = arith.constant 0 : index
    %6 = vector.load %arg8[%c4, %c0_6] : memref<36x384xf32, #tpu.memory_space<vmem>>, vector<4x384xf32>
    tpu.vector_store %arg8[%c4, %c0_6], %5 {strides = array<i32>} : memref<36x384xf32, #tpu.memory_space<vmem>>, vector<4x384xf32>,
    %c17_i32 = arith.constant 17 : i32
    %7 = tpu.dynamic_rotate %1 by %c17_i32 dim 1 : vector<4x384xf32>, i32 -> vector<4x384xf32>
    %c8 = arith.constant 8 : index
    %c0_7 = arith.constant 0 : index
    %8 = vector.load %arg8[%c8, %c0_7] : memref<36x384xf32, #tpu.memory_space<vmem>>, vector<4x384xf32>
    tpu.vector_store %arg8[%c8, %c0_7], %7 {strides = array<i32>} : memref<36x384xf32, #tpu.memory_space<vmem>>, vector<4x384xf32>,
    %c1_i32 = arith.constant 1 : i32
    %9 = tpu.dynamic_rotate %1 by %c1_i32 dim 1 : vector<4x384xf32>, i32 -> vector<4x384xf32>
    %c12 = arith.constant 12 : index
    %c0_8 = arith.constant 0 : index
    %10 = vector.load %arg8[%c12, %c0_8] : memref<36x384xf32, #tpu.memory_space<vmem>>, vector<4x384xf32>
    tpu.vector_store %arg8[%c12, %c0_8], %9 {strides = array<i32>} : memref<36x384xf32, #tpu.memory_space<vmem>>, vector<4x384xf32>,
    %c16 = arith.constant 16 : index
    %c0_9 = arith.constant 0 : index
    %11 = vector.load %arg8[%c16, %c0_9] : memref<36x384xf32, #tpu.memory_space<vmem>>, vector<4x384xf32>
    tpu.vector_store %arg8[%c16, %c0_9], %1 {strides = array<i32>} : memref<36x384xf32, #tpu.memory_space<vmem>>, vector<4x384xf32>,
    %c383_i32 = arith.constant 383 : i32
    %12 = tpu.dynamic_rotate %1 by %c383_i32 dim 1 : vector<4x384xf32>, i32 -> vector<4x384xf32>
    %c20 = arith.constant 20 : index
    %c0_10 = arith.constant 0 : index
    %13 = vector.load %arg8[%c20, %c0_10] : memref<36x384xf32, #tpu.memory_space<vmem>>, vector<4x384xf32>
    tpu.vector_store %arg8[%c20, %c0_10], %12 {strides = array<i32>} : memref<36x384xf32, #tpu.memory_space<vmem>>, vector<4x384xf32>,
    %c367_i32 = arith.constant 367 : i32
    %14 = tpu.dynamic_rotate %1 by %c367_i32 dim 1 : vector<4x384xf32>, i32 -> vector<4x384xf32>
    %c24 = arith.constant 24 : index
    %c0_11 = arith.constant 0 : index
    %15 = vector.load %arg8[%c24, %c0_11] : memref<36x384xf32, #tpu.memory_space<vmem>>, vector<4x384xf32>
    tpu.vector_store %arg8[%c24, %c0_11], %14 {strides = array<i32>} : memref<36x384xf32, #tpu.memory_space<vmem>>, vector<4x384xf32>,
    %c366_i32 = arith.constant 366 : i32
    %16 = tpu.dynamic_rotate %1 by %c366_i32 dim 1 : vector<4x384xf32>, i32 -> vector<4x384xf32>
    %c28 = arith.constant 28 : index
    %c0_12 = arith.constant 0 : index
    %17 = vector.load %arg8[%c28, %c0_12] : memref<36x384xf32, #tpu.memory_space<vmem>>, vector<4x384xf32>
    tpu.vector_store %arg8[%c28, %c0_12], %16 {strides = array<i32>} : memref<36x384xf32, #tpu.memory_space<vmem>>, vector<4x384xf32>,
    %c365_i32 = arith.constant 365 : i32
    %18 = tpu.dynamic_rotate %1 by %c365_i32 dim 1 : vector<4x384xf32>, i32 -> vector<4x384xf32>
    %c32 = arith.constant 32 : index
    %c0_13 = arith.constant 0 : index
    %19 = vector.load %arg8[%c32, %c0_13] : memref<36x384xf32, #tpu.memory_space<vmem>>, vector<4x384xf32>
    tpu.vector_store %arg8[%c32, %c0_13], %18 {strides = array<i32>} : memref<36x384xf32, #tpu.memory_space<vmem>>, vector<4x384xf32>,
    %c0_14 = arith.constant 0 : index
    %c0_15 = arith.constant 0 : index
    %20 = vector.load %arg3[%c0_14, %c0_15] : memref<4x36xf32, #tpu.memory_space<vmem>>, vector<4x36xf32>
    %c0_16 = arith.constant 0 : index
    %c0_17 = arith.constant 0 : index
    %21 = vector.load %arg8[%c0_16, %c0_17] : memref<36x384xf32, #tpu.memory_space<vmem>>, vector<36x384xf32>
    %cst = arith.constant dense<0.000000e+00> : vector<4x384xf32>
    %22 = tpu.matmul %20, %21, %cst {dimension_numbers = #tpu.dot_dimension_numbers<[1], [0], [0], [1], [0, 0, 1, 1], [], []>} : vector<4x36xf32>, vector<36x384xf32>, vector<4x384xf32> -> vector<4x384xf32>
    %c0_18 = arith.constant 0 : index
    %c0_19 = arith.constant 0 : index
    %23 = vector.load %arg4[%c0_18, %c0_19] : memref<4x1xf32, #tpu.memory_space<vmem>>, vector<4x1xf32>
    %24 = vector.broadcast %23 : vector<4x1xf32> to vector<4x384xf32>
    %25 = arith.addf %22, %24 : vector<4x384xf32>
    %26 = vector.broadcast %2 : vector<1x384xf32> to vector<4x384xf32>
    %27 = arith.mulf %25, %26 : vector<4x384xf32>
    %cst_20 = arith.constant dense<0.000000e+00> : vector<4xf32>
    %28 = vector.multi_reduction <add>, %27, %cst_20 [1] : vector<4x384xf32> to vector<4xf32>
    %29 = vector.shape_cast %28 : vector<4xf32> to vector<4x1xf32>
    %cst_21 = arith.constant 3.906250e-03 : f32
    %30 = vector.broadcast %cst_21 : f32 to vector<4x1xf32>
    %31 = arith.mulf %29, %30 : vector<4x1xf32>
    %32 = vector.broadcast %31 : vector<4x1xf32> to vector<4x384xf32>
    %33 = arith.subf %25, %32 : vector<4x384xf32>
    %34 = arith.mulf %33, %33 : vector<4x384xf32>
    %35 = vector.broadcast %2 : vector<1x384xf32> to vector<4x384xf32>
    %36 = arith.mulf %34, %35 : vector<4x384xf32>
    %cst_22 = arith.constant dense<0.000000e+00> : vector<4xf32>
    %37 = vector.multi_reduction <add>, %36, %cst_22 [1] : vector<4x384xf32> to vector<4xf32>
    %38 = vector.shape_cast %37 : vector<4xf32> to vector<4x1xf32>
    %cst_23 = arith.constant 3.906250e-03 : f32
    %39 = vector.broadcast %cst_23 : f32 to vector<4x1xf32>
    %40 = arith.mulf %38, %39 : vector<4x1xf32>
    %cst_24 = arith.constant 9.99999974E-6 : f32
    %41 = vector.broadcast %cst_24 : f32 to vector<4x1xf32>
    %42 = arith.addf %40, %41 : vector<4x1xf32>
    %43 = math.rsqrt %42 : vector<4x1xf32>
    %44 = vector.broadcast %43 : vector<4x1xf32> to vector<4x384xf32>
    %45 = arith.mulf %33, %44 : vector<4x384xf32>
    %cst_25 = arith.constant 0.000000e+00 : f32
    %46 = vector.broadcast %cst_25 : f32 to vector<4x384xf32>
    %47 = arith.maximumf %45, %46 : vector<4x384xf32>
    %48 = vector.broadcast %2 : vector<1x384xf32> to vector<4x384xf32>
    %49 = arith.mulf %47, %48 : vector<4x384xf32>
    %c19_i32_26 = arith.constant 19 : i32
    %50 = tpu.dynamic_rotate %49 by %c19_i32_26 dim 1 : vector<4x384xf32>, i32 -> vector<4x384xf32>
    %c0_27 = arith.constant 0 : index
    %c0_28 = arith.constant 0 : index
    %51 = vector.load %arg8[%c0_27, %c0_28] : memref<36x384xf32, #tpu.memory_space<vmem>>, vector<4x384xf32>
    tpu.vector_store %arg8[%c0_27, %c0_28], %50 {strides = array<i32>} : memref<36x384xf32, #tpu.memory_space<vmem>>, vector<4x384xf32>,
    %c18_i32_29 = arith.constant 18 : i32
    %52 = tpu.dynamic_rotate %49 by %c18_i32_29 dim 1 : vector<4x384xf32>, i32 -> vector<4x384xf32>
    %c4_30 = arith.constant 4 : index
    %c0_31 = arith.constant 0 : index
    %53 = vector.load %arg8[%c4_30, %c0_31] : memref<36x384xf32, #tpu.memory_space<vmem>>, vector<4x384xf32>
    tpu.vector_store %arg8[%c4_30, %c0_31], %52 {strides = array<i32>} : memref<36x384xf32, #tpu.memory_space<vmem>>, vector<4x384xf32>,
    %c17_i32_32 = arith.constant 17 : i32
    %54 = tpu.dynamic_rotate %49 by %c17_i32_32 dim 1 : vector<4x384xf32>, i32 -> vector<4x384xf32>
    %c8_33 = arith.constant 8 : index
    %c0_34 = arith.constant 0 : index
    %55 = vector.load %arg8[%c8_33, %c0_34] : memref<36x384xf32, #tpu.memory_space<vmem>>, vector<4x384xf32>
    tpu.vector_store %arg8[%c8_33, %c0_34], %54 {strides = array<i32>} : memref<36x384xf32, #tpu.memory_space<vmem>>, vector<4x384xf32>,
    %c1_i32_35 = arith.constant 1 : i32
    %56 = tpu.dynamic_rotate %49 by %c1_i32_35 dim 1 : vector<4x384xf32>, i32 -> vector<4x384xf32>
    %c12_36 = arith.constant 12 : index
    %c0_37 = arith.constant 0 : index
    %57 = vector.load %arg8[%c12_36, %c0_37] : memref<36x384xf32, #tpu.memory_space<vmem>>, vector<4x384xf32>
    tpu.vector_store %arg8[%c12_36, %c0_37], %56 {strides = array<i32>} : memref<36x384xf32, #tpu.memory_space<vmem>>, vector<4x384xf32>,
    %c16_38 = arith.constant 16 : index
    %c0_39 = arith.constant 0 : index
    %58 = vector.load %arg8[%c16_38, %c0_39] : memref<36x384xf32, #tpu.memory_space<vmem>>, vector<4x384xf32>
    tpu.vector_store %arg8[%c16_38, %c0_39], %49 {strides = array<i32>} : memref<36x384xf32, #tpu.memory_space<vmem>>, vector<4x384xf32>,
    %c383_i32_40 = arith.constant 383 : i32
    %59 = tpu.dynamic_rotate %49 by %c383_i32_40 dim 1 : vector<4x384xf32>, i32 -> vector<4x384xf32>
    %c20_41 = arith.constant 20 : index
    %c0_42 = arith.constant 0 : index
    %60 = vector.load %arg8[%c20_41, %c0_42] : memref<36x384xf32, #tpu.memory_space<vmem>>, vector<4x384xf32>
    tpu.vector_store %arg8[%c20_41, %c0_42], %59 {strides = array<i32>} : memref<36x384xf32, #tpu.memory_space<vmem>>, vector<4x384xf32>,
    %c367_i32_43 = arith.constant 367 : i32
    %61 = tpu.dynamic_rotate %49 by %c367_i32_43 dim 1 : vector<4x384xf32>, i32 -> vector<4x384xf32>
    %c24_44 = arith.constant 24 : index
    %c0_45 = arith.constant 0 : index
    %62 = vector.load %arg8[%c24_44, %c0_45] : memref<36x384xf32, #tpu.memory_space<vmem>>, vector<4x384xf32>
    tpu.vector_store %arg8[%c24_44, %c0_45], %61 {strides = array<i32>} : memref<36x384xf32, #tpu.memory_space<vmem>>, vector<4x384xf32>,
    %c366_i32_46 = arith.constant 366 : i32
    %63 = tpu.dynamic_rotate %49 by %c366_i32_46 dim 1 : vector<4x384xf32>, i32 -> vector<4x384xf32>
    %c28_47 = arith.constant 28 : index
    %c0_48 = arith.constant 0 : index
    %64 = vector.load %arg8[%c28_47, %c0_48] : memref<36x384xf32, #tpu.memory_space<vmem>>, vector<4x384xf32>
    tpu.vector_store %arg8[%c28_47, %c0_48], %63 {strides = array<i32>} : memref<36x384xf32, #tpu.memory_space<vmem>>, vector<4x384xf32>,
    %c365_i32_49 = arith.constant 365 : i32
    %65 = tpu.dynamic_rotate %49 by %c365_i32_49 dim 1 : vector<4x384xf32>, i32 -> vector<4x384xf32>
    %c32_50 = arith.constant 32 : index
    %c0_51 = arith.constant 0 : index
    %66 = vector.load %arg8[%c32_50, %c0_51] : memref<36x384xf32, #tpu.memory_space<vmem>>, vector<4x384xf32>
    tpu.vector_store %arg8[%c32_50, %c0_51], %65 {strides = array<i32>} : memref<36x384xf32, #tpu.memory_space<vmem>>, vector<4x384xf32>,
    %c0_52 = arith.constant 0 : index
    %c0_53 = arith.constant 0 : index
    %67 = vector.load %arg5[%c0_52, %c0_53] : memref<4x36xf32, #tpu.memory_space<vmem>>, vector<4x36xf32>
    %c0_54 = arith.constant 0 : index
    %c0_55 = arith.constant 0 : index
    %68 = vector.load %arg8[%c0_54, %c0_55] : memref<36x384xf32, #tpu.memory_space<vmem>>, vector<36x384xf32>
    %cst_56 = arith.constant dense<0.000000e+00> : vector<4x384xf32>
    %69 = tpu.matmul %67, %68, %cst_56 {dimension_numbers = #tpu.dot_dimension_numbers<[1], [0], [0], [1], [0, 0, 1, 1], [], []>} : vector<4x36xf32>, vector<36x384xf32>, vector<4x384xf32> -> vector<4x384xf32>
    %c0_57 = arith.constant 0 : index
    %c0_58 = arith.constant 0 : index
    %70 = vector.load %arg6[%c0_57, %c0_58] : memref<4x1xf32, #tpu.memory_space<vmem>>, vector<4x1xf32>
    %71 = vector.broadcast %70 : vector<4x1xf32> to vector<4x384xf32>
    %72 = arith.addf %69, %71 : vector<4x384xf32>
    %73 = vector.broadcast %2 : vector<1x384xf32> to vector<4x384xf32>
    %74 = arith.mulf %72, %73 : vector<4x384xf32>
    %cst_59 = arith.constant dense<0.000000e+00> : vector<4xf32>
    %75 = vector.multi_reduction <add>, %74, %cst_59 [1] : vector<4x384xf32> to vector<4xf32>
    %76 = vector.shape_cast %75 : vector<4xf32> to vector<4x1xf32>
    %cst_60 = arith.constant 3.906250e-03 : f32
    %77 = vector.broadcast %cst_60 : f32 to vector<4x1xf32>
    %78 = arith.mulf %76, %77 : vector<4x1xf32>
    %79 = vector.broadcast %78 : vector<4x1xf32> to vector<4x384xf32>
    %80 = arith.subf %72, %79 : vector<4x384xf32>
    %81 = arith.mulf %80, %80 : vector<4x384xf32>
    %82 = vector.broadcast %2 : vector<1x384xf32> to vector<4x384xf32>
    %83 = arith.mulf %81, %82 : vector<4x384xf32>
    %cst_61 = arith.constant dense<0.000000e+00> : vector<4xf32>
    %84 = vector.multi_reduction <add>, %83, %cst_61 [1] : vector<4x384xf32> to vector<4xf32>
    %85 = vector.shape_cast %84 : vector<4xf32> to vector<4x1xf32>
    %cst_62 = arith.constant 3.906250e-03 : f32
    %86 = vector.broadcast %cst_62 : f32 to vector<4x1xf32>
    %87 = arith.mulf %85, %86 : vector<4x1xf32>
    %cst_63 = arith.constant 9.99999974E-6 : f32
    %88 = vector.broadcast %cst_63 : f32 to vector<4x1xf32>
    %89 = arith.addf %87, %88 : vector<4x1xf32>
    %90 = math.rsqrt %89 : vector<4x1xf32>
    %91 = vector.broadcast %90 : vector<4x1xf32> to vector<4x384xf32>
    %92 = arith.mulf %80, %91 : vector<4x384xf32>
    %93 = vector.broadcast %2 : vector<1x384xf32> to vector<4x384xf32>
    %94 = arith.mulf %92, %93 : vector<4x384xf32>
    %95 = arith.addf %94, %1 : vector<4x384xf32>
    %c0_64 = arith.constant 0 : index
    %c0_65 = arith.constant 0 : index
    %c0_66 = arith.constant 0 : index
    %96 = vector.load %arg7[%c0_64, %c0_65, %c0_66] : memref<1x4x384xf32, #tpu.memory_space<vmem>>, vector<1x4x384xf32>
    %97 = vector.shape_cast %96 : vector<1x4x384xf32> to vector<4x384xf32>
    %98 = vector.shape_cast %95 : vector<4x384xf32> to vector<1x4x384xf32>
    tpu.vector_store %arg7[%c0_64, %c0_65, %c0_66], %98 {strides = array<i32>} : memref<1x4x384xf32, #tpu.memory_space<vmem>>, vector<1x4x384xf32>,
    return
  }
  func.func @transform_0(%arg0: i32) -> (i32, i32, i32) {
    %c0_i32 = arith.constant 0 : i32
    %c0_i32_0 = arith.constant 0 : i32
    %c0_i32_1 = arith.constant 0 : i32
    return %arg0, %c0_i32, %c0_i32_0 : i32, i32, i32
  }
  func.func @transform_1(%arg0: i32) -> (i32, i32) {
    %c0_i32 = arith.constant 0 : i32
    %c0_i32_0 = arith.constant 0 : i32
    %c0_i32_1 = arith.constant 0 : i32
    return %c0_i32, %c0_i32_0 : i32, i32
  }
  func.func @transform_2(%arg0: i32) -> (i32, i32) {
    %c0_i32 = arith.constant 0 : i32
    %c0_i32_0 = arith.constant 0 : i32
    %c0_i32_1 = arith.constant 0 : i32
    return %c0_i32, %c0_i32_0 : i32, i32
  }
  func.func @transform_3(%arg0: i32) -> (i32, i32) {
    %c0_i32 = arith.constant 0 : i32
    %c0_i32_0 = arith.constant 0 : i32
    %c0_i32_1 = arith.constant 0 : i32
    return %c0_i32, %c0_i32_0 : i32, i32
  }
  func.func @transform_4(%arg0: i32) -> (i32, i32) {
    %c0_i32 = arith.constant 0 : i32
    %c0_i32_0 = arith.constant 0 : i32
    %c0_i32_1 = arith.constant 0 : i32
    return %c0_i32, %c0_i32_0 : i32, i32
  }
  func.func @transform_5(%arg0: i32) -> (i32, i32) {
    %c0_i32 = arith.constant 0 : i32
    %c0_i32_0 = arith.constant 0 : i32
    %c0_i32_1 = arith.constant 0 : i32
    return %c0_i32, %c0_i32_0 : i32, i32
  }
  func.func @transform_6(%arg0: i32) -> (i32, i32, i32) {
    %c0_i32 = arith.constant 0 : i32
    %c0_i32_0 = arith.constant 0 : i32
    %c0_i32_1 = arith.constant 0 : i32
    return %arg0, %c0_i32, %c0_i32_0 : i32, i32, i32
  }
}

</mosaic_0001>

<bundles_post_ra>
// kernel: residual_block.1
= control target key start
LH: loop header
LB: loop body
LE: loop exit
PB: predicated region body
PF: predicated region fallthrough
CT: control target
= control target key end

     0   :  { %s1182_s21 = smov 0   ;;  %s1477_s0 = inlined_call_operand.vmem [shape: f32[2,4,384], index: 0, kind: input, shape index: {}]   ;;  %s1478_s1 = inlined_call_operand.vmem [shape: f32[1,384], index: 1, kind: input, shape index: {}]   ;;  %s1479_s2 = inlined_call_operand.vmem [shape: f32[4,36], index: 2, kind: input, shape index: {}]   ;;  %s1480_s3 = inlined_call_operand.vmem [shape: f32[4,1], index: 3, kind: input, shape index: {}]   ;;  %s1481_s4 = inlined_call_operand.vmem [shape: f32[4,36], index: 4, kind: input, shape index: {}]   ;;  %s1482_s5 = inlined_call_operand.vmem [shape: f32[4,1], index: 5, kind: input, shape index: {}]   ;;  %s1483_s6 = inlined_call_operand.vmem [shape: f32[2,4,384], index: 6, kind: output, shape index: {}]  }
   0x1 LB: > { %s1045_s22 = sadd.s32 4294967295, %s1134_s21   ;;  %p1049_p0 = scmp.ge.s32.totalorder %s1134_s21, 1  ;;  %s1134_s21 = sphi %s1182_s21, %s16_s21  }
   0x2   : > { %p212_p1 = scmp.lt.s32.totalorder %s1134_s21, 3 }
   0x4   : > { %p213_p2 = pnand %p1049_p0, %p212_p1 }
   0x5   : > { %p242_p3 = scmp.lt.s32.totalorder (!%p213_p2), %s1045_s22, 1  ;;  %s1137_s27 = smov (!%p213_p2), 109  }
   0x6   : > { %216 = sbr.rel (%p213_p2) target bundleno = 1396 (0x574), region = 44  ;;  %s1138_s28 = smov (!%p213_p2), 110  }
   0x7   : > { %s1139_s29 = smov (!%p213_p2), 127   ;;  %s1140_s30 = smov (!%p213_p2), 111  }
   0x8   : > { %s1141_s7 = smov (!%p213_p2), 1   ;;  %s1142_s8 = smov (!%p213_p2), 18  }
   0x9   : > { %s1143_s9 = smov (!%p213_p2), 17   ;;  %s1144_s10 = smov (!%p213_p2), 19  }
   0xb   : > { %s1485_s22 = smov (!%p242_p3, %s1045_s22), 1  ;;  %v1136_v2 = vmov 0.0   ;;  %vm1145_vm0 = vmmov 0   ;;  %v1146_v4 = vmov 0   ;;  %v419_v5 = vld [vmem:[%s1480_s3] sm:$0xf]  ;;  %v264_v6 = vlaneseq }
   0xc   : > { %s1102_s23 = smul.u32 12, %s1485_s22  ;;  %1076 = vmatprep.subr.mxu1 %v1136_v2  ;;  %503 = vmatprep.mubr.f32.mxu0 %v1136_v2  ;;  %vm429_vm4 = vcmask 1043456   ;;  %vm425_vm10 = vcmask 293888  }
   0xd   : > { %1086 = vmatprep.mubr.msk.f32.mxu1 %vm1145_vm0, %v1136_v2  ;;  %1122 = vset.pattern.permute.xlu0 %v1146_v4  ;;  %v1265_v7 = vand.u32 127, %v264_v6 }
   0xe   : > { %s246_s26 = scalar_lea.vmem %s1477_s0, %s1102_s23 }
   0xf   : > { %v1198_v0 = vld [vmem:[%s246_s26 + $0x8] sm:$0xf]  ;;  %v1200_v1 = vld [vmem:[%s246_s26] sm:$0xff]  ;;  %vm396_vm1 = vcmp.lt.s32.totalorder %v1265_v7, 109  ;;  %vm374_vm2 = vcmp.lt.s32.totalorder %v1265_v7, 110  ;;  %vm339_vm3 = vcmp.lt.s32.totalorder %v1265_v7, 127  ;;  %s251_s26 = scalar_lea.vmem %s1483_s6, %s1102_s23 }
  0x10   : > { %394 = vrot.lane.b32.xlu1 %v1198_v0, %s1137_s27  ;;  %330 = vst [vmem:[#allocation2 + $0x8] sm:$0xf] %v1200_v1  ;;  %332 = vst [vmem:[#allocation2 + $0x40] sm:$0xf] %v1198_v0  ;;  %372 = vrot.lane.b32.xlu0 %v1198_v0, %s1138_s28  ;;  %v1212_v3 = vcombine.high %v1200_v1, %v1200_v1  ;;  %vm361_vm5 = vcmp.lt.s32.totalorder %v1265_v7, 111  ;;  %vm314_vm6 = vcmp.lt.s32.totalorder %v1265_v7, 1 }
  0x11   : > { %vm279_vm7 = vcmp.lt.s32.totalorder %v1265_v7, 18  ;;  %vm301_vm8 = vcmp.lt.s32.totalorder %v1265_v7, 17  ;;  %vm266_vm9 = vcmp.lt.s32.totalorder %v1265_v7, 19 }
  0x12   : > { %331 = vst [vmem:[#allocation2 + $0x48] sm:$0xf] %v1212_v3 }
  0x14   : > { %390 = vrot.lane.b32.xlu1 %v1200_v1, %s1137_s27  ;;  %368 = vrot.lane.b32.xlu0 %v1200_v1, %s1138_s28 }
  0x18   : > { %392 = vrot.lane.b32.xlu1 %v1212_v3, %s1137_s27  ;;  %370 = vrot.lane.b32.xlu0 %v1212_v3, %s1138_s28 }
  0x1c   : > { %337 = vrot.lane.b32.xlu1 %v1198_v0, %s1139_s29  ;;  %335 = vrot.lane.b32.xlu0 %v1212_v3, %s1139_s29 }
  0x20   : > { %359 = vrot.lane.b32.xlu1 %v1198_v0, %s1140_s30  ;;  %357 = vrot.lane.b32.xlu0 %v1212_v3, %s1140_s30 }
  0x24   : > { %355 = vrot.lane.b32.xlu1 %v1200_v1, %s1140_s30  ;;  %333 = vrot.lane.b32.xlu0 %v1200_v1, %s1139_s29 }
  0x28   : > { %310 = vrot.lane.b32.xlu1 %v1212_v3, %s1141_s7  ;;  %308 = vrot.lane.b32.xlu0 %v1200_v1, %s1141_s7 }
  0x2c   : > { %273 = vrot.lane.b32.xlu1 %v1200_v1, %s1142_s8  ;;  %312 = vrot.lane.b32.xlu0 %v1198_v0, %s1141_s7 }
  0x30   : > { %295 = vrot.lane.b32.xlu1 %v1200_v1, %s1143_s9  ;;  %275 = vrot.lane.b32.xlu0 %v1212_v3, %s1142_s8 }
  0x34   : > { %277 = vrot.lane.b32.xlu1 %v1198_v0, %s1142_s8  ;;  %297 = vrot.lane.b32.xlu0 %v1212_v3, %s1143_s9 }
  0x38   : > { %258 = vrot.lane.b32.xlu1 %v1200_v1, %s1144_s10  ;;  %299 = vrot.lane.b32.xlu0 %v1198_v0, %s1143_s9 }
  0x3c   : > { %262 = vrot.lane.b32.xlu1 %v1198_v0, %s1144_s10  ;;  %260 = vrot.lane.b32.xlu0 %v1212_v3, %s1144_s10 }
  0x40   : > { %422 = vperm.xlu0 %1122, %v419_v5  }
  0x82   : > { %v395_v8 = vpop.permute.xlu1 %394  ;;  %v373_v9 = vpop.permute.xlu0 %372 }
  0x86   : > { %v391_v10 = vpop.permute.xlu1 %390  ;;  %v369_v11 = vpop.permute.xlu0 %368 }
  0x87   : > { %v399_v12 = vsel %vm396_vm1, %v395_v8, %v391_v10  ;;  %v377_v13 = vsel %vm374_vm2, %v373_v9, %v369_v11 }
  0x88   : > { %402 = vst [vmem:[#allocation2 + $0x28] sm:$0xf] %v399_v12  ;;  %v383_v14 = vrot.slane %v377_v13, 4 }
  0x8a   : > { %389 = vst [vmem:[#allocation2 + $0x38] sm:$0xf0] %v383_v14  ;;  %v393_v15 = vpop.permute.xlu1 %392  ;;  %v371_v16 = vpop.permute.xlu0 %370 }
  0x8b   : > { %v397_v17 = vsel %vm396_vm1, %v393_v15, %v395_v8  ;;  %v398_v18 = vsel %vm396_vm1, %v391_v10, %v393_v15  ;;  %v375_v19 = vsel %vm374_vm2, %v371_v16, %v373_v9  ;;  %v376_v20 = vsel %vm374_vm2, %v369_v11, %v371_v16 }
  0x8c   : > { %400 = vst [vmem:[#allocation2 + $0x60] sm:$0xf] %v398_v18  ;;  %401 = vst [vmem:[#allocation2 + $0x70] sm:$0xf] %v397_v17  ;;  %v381_v21 = vrot.slane %v376_v20, 4  ;;  %v382_v22 = vrot.slane %v375_v19, 4 }
  0x8e   : > { %387 = vst [vmem:[#allocation2 + $0x20] sm:$0xf0] %v381_v21  ;;  %388 = vst [vmem:[#allocation2 + $0x10] sm:$0xf0] %v382_v22  ;;  %v338_v23 = vpop.permute.xlu1 %337  ;;  %v336_v24 = vpop.permute.xlu0 %335  ;;  %v403_v22 = vld [vmem:[%s1479_s2] sm:$0xf] }
  0x8f   : > { %v340_v25 = vsel %vm339_vm3, %v336_v24, %v338_v23  ;;  %v418_v26 = vld [vmem:[#allocation2 + $0x28] sm:$0xf] }
  0x90   : > { %v347_v27 = vrot.slane %v340_v25, 4  ;;  %1077 = vmatpush3.msk.msra.mxu1 %vm429_vm4, %v418_v26  ;;  %v582_v26 = vshrl.u32 %v264_v6, 7 }
  0x91   : > { %1078 = vmatprep.subr.mxu1 %v1136_v2 }
  0x92   : > { %353 = vst [vmem:[#allocation2 + $0x48] sm:$0xf0] %v347_v27  ;;  %v360_v28 = vpop.permute.xlu1 %359  ;;  %v358_v29 = vpop.permute.xlu0 %357  ;;  %v583_v27 = vsub.s32 0, %v582_v26 }
  0x93   : > { %v362_v30 = vsel %vm361_vm5, %v358_v29, %v360_v28  ;;  %v417_v31 = vld [vmem:[#allocation2 + $0x70] sm:$0xf]  ;;  %v416_v32 = vld [vmem:[#allocation2 + $0x60] sm:$0xf] }
  0x94   : > { %366 = vst [vmem:[#allocation2 + $0x10] sm:$0xf] %v362_v30  ;;  %1052 = vmatprep.subr.msk.mxu0 %vm429_vm4, %v417_v31  ;;  %v591_v30 = vsub.s32 2, %v582_v26 }
  0x95   : > { %1053 = vmatpush1.msk.msra.mxu0 %vm429_vm4, %v416_v32 }
  0x96   : > { %v356_v33 = vpop.permute.xlu1 %355  ;;  %v334_v34 = vpop.permute.xlu0 %333 }
  0x97   : > { %v363_v35 = vsel %vm361_vm5, %v356_v33, %v358_v29  ;;  %v364_v36 = vsel %vm361_vm5, %v360_v28, %v356_v33  ;;  %v341_v37 = vsel %vm339_vm3, %v334_v34, %v336_v24  ;;  %v342_v38 = vsel %vm339_vm3, %v338_v23, %v334_v34  ;;  %v254_v28 = vld [vmem:[%s1478_s1] sm:$0x7] }
  0x98   : > { %365 = vst [vmem:[#allocation2 + $0x20] sm:$0xf] %v363_v35  ;;  %367 = vst [vmem:[#allocation2 + $0x38] sm:$0xf] %v364_v36  ;;  %v346_v39 = vrot.slane %v341_v37, 4  ;;  %v348_v40 = vrot.slane %v342_v38, 4  ;;  %v1343_v32 = vrot.slane %v254_v28, %v583_v27  ;;  %v1347_v38 = vrot.slane %v254_v28, %v591_v30 }
  0x99   : > { %v411_v54 = vld [vmem:[#allocation2 + $0x48] sm:$0xff]  ;;  %v587_v29 = vsub.s32 1, %v582_v26 }
  0x9a   : > { %352 = vst [vmem:[#allocation2 + $0x8] sm:$0xf0] %v346_v39  ;;  %354 = vst [vmem:[#allocation2 + $0x40] sm:$0xf0] %v348_v40  ;;  %v311_v41 = vpop.permute.xlu1 %310  ;;  %v309_v42 = vpop.permute.xlu0 %308 }
  0x9b   : > { %v316_v43 = vsel %vm314_vm6, %v309_v42, %v311_v41  ;;  %v414_v44 = vld [vmem:[#allocation2 + $0x10] sm:$0xff]  ;;  %v1345_v36 = vrot.slane %v254_v28, %v587_v29 }
  0x9c   : > { %v322_v45 = vrot.slane %v316_v43, 4  ;;  %463 = vmatprep.subr.mxu0 %v414_v44 }
  0x9e   : > { %328 = vst [vmem:[#allocation2 + $0x50] sm:$0xf0] %v322_v45  ;;  %v274_v46 = vpop.permute.xlu1 %273  ;;  %v313_v47 = vpop.permute.xlu0 %312 }
  0x9f   : > { %v315_v48 = vsel %vm314_vm6, %v311_v41, %v313_v47  ;;  %v317_v49 = vsel %vm314_vm6, %v313_v47, %v309_v42  ;;  %v413_v50 = vld [vmem:[#allocation2 + $0x20] sm:$0xff]  ;;  %v415_v51 = vld [vmem:[#allocation2 + $0x38] sm:$0xff] }
  0xa0   : > { %v321_v52 = vrot.slane %v317_v49, 4  ;;  %v323_v53 = vrot.slane %v315_v48, 4  ;;  %464 = vmatpush1.msra.mxu0 %v413_v50  ;;  %1079 = vmatpush3.msra.mxu1 %v415_v51 }
  0xa1   : > { %465 = vmatprep.subr.mxu0 %v411_v54  ;;  %1080 = vmatprep.subr.mxu1 %v1136_v2  ;;  %v412_v55 = vld [vmem:[#allocation2 + $0x40] sm:$0xff]  ;;  %v410_v56 = vld [vmem:[#allocation2 + $0x8] sm:$0xff] }
  0xa2   : > { %327 = vst [vmem:[#allocation2 + $0x18] sm:$0xf0] %v321_v52  ;;  %329 = vst [vmem:[#allocation2 + $0x68] sm:$0xf0] %v323_v53  ;;  %v296_v57 = vpop.permute.xlu1 %295  ;;  %1081 = vmatpush3.msra.mxu1 %v412_v55  ;;  %v276_v58 = vpop.permute.xlu0 %275  ;;  %466 = vmatpush1.msra.mxu0 %v410_v56 }
  0xa3   : > { %v281_v59 = vsel %vm279_vm7, %v274_v46, %v276_v58  ;;  %1082 = vmatprep.subr.mxu1 %v1136_v2 }
  0xa4   : > { %v287_v60 = vrot.slane %v281_v59, 4 }
  0xa6   : > { %293 = vst [vmem:[#allocation2] sm:$0xf0] %v287_v60  ;;  %v278_v61 = vpop.permute.xlu1 %277  ;;  %v298_v62 = vpop.permute.xlu0 %297 }
  0xa7   : > { %v280_v63 = vsel %vm279_vm7, %v276_v58, %v278_v61  ;;  %v282_v4 = vsel %vm279_vm7, %v278_v61, %v274_v46  ;;  %v303_v5 = vsel %vm301_vm8, %v296_v57, %v298_v62 }
  0xa8   : > { %v286_v8 = vrot.slane %v282_v4, 4  ;;  %v288_v9 = vrot.slane %v280_v63, 4  ;;  %306 = vst [vmem:[#allocation2 + $0x50] sm:$0xf] %v303_v5 }
  0xaa   : > { %292 = vst [vmem:[#allocation2 + $0x30] sm:$0xf0] %v286_v8  ;;  %294 = vst [vmem:[#allocation2 + $0x58] sm:$0xf0] %v288_v9  ;;  %v259_v10 = vpop.permute.xlu1 %258  ;;  %v300_v11 = vpop.permute.xlu0 %299 }
  0xab   : > { %v302_v12 = vsel %vm301_vm8, %v298_v62, %v300_v11  ;;  %v304_v13 = vsel %vm301_vm8, %v300_v11, %v296_v57 }
  0xac   : > { %305 = vst [vmem:[#allocation2 + $0x18] sm:$0xf] %v304_v13  ;;  %307 = vst [vmem:[#allocation2 + $0x68] sm:$0xf] %v302_v12 }
  0xae   : > { %v263_v14 = vpop.permute.xlu1 %262  ;;  %v261_v15 = vpop.permute.xlu0 %260 }
  0xaf   : > { %v269_v16 = vsel %vm266_vm9, %v263_v14, %v259_v10  ;;  %v267_v17 = vsel %vm266_vm9, %v261_v15, %v263_v14  ;;  %v268_v18 = vsel %vm266_vm9, %v259_v10, %v261_v15  ;;  %v408_v19 = vld [vmem:[#allocation2 + $0x50] sm:$0xff] }
  0xb0   : > { %270 = vst [vmem:[#allocation2 + $0x30] sm:$0xf] %v269_v16  ;;  %271 = vst [vmem:[#allocation2] sm:$0xf] %v268_v18  ;;  %467 = vmatprep.subr.mxu0 %v408_v19 }
  0xb1   : > { %272 = vst [vmem:[#allocation2 + $0x58] sm:$0xf] %v267_v17 }
  0xb3   : > { %v407_v20 = vld [vmem:[#allocation2 + $0x18] sm:$0xff]  ;;  %v409_v21 = vld [vmem:[#allocation2 + $0x68] sm:$0xff] }
  0xb4   : > { %468 = vmatpush1.msra.mxu0 %v407_v20  ;;  %1083 = vmatpush3.msra.mxu1 %v409_v21  ;;  %v786_v20 = vld [vmem:[%s1482_s5] sm:$0xf] }
  0xb5   : > { %1084 = vmatprep.subr.mxu1 %v1136_v2 }
  0xb7   : > { %v405_v23 = vld [vmem:[#allocation2] sm:$0xff]  ;;  %v404_v25 = vld [vmem:[#allocation2 + $0x30] sm:$0xff] }
  0xb8   : > { %v406_v24 = vld [vmem:[#allocation2 + $0x58] sm:$0xff]  ;;  %469 = vmatprep.subr.mxu0 %v405_v23 }
  0xb9   : > { %1085 = vmatpush3.msra.mxu1 %v406_v24  ;;  %470 = vmatpush1.msra.mxu0 %v404_v25 }
  0xba   : > { %1087 = vmatmul.mubr.msk.f32.vlgmr.msra.gmra.mxu1 %vm425_vm10, %v403_v22  ;;  %1054 = vmatmul.mubr.msk.f32.vlgmr.msra.gmra.mxu0 %vm425_vm10, %v403_v22 }
  0xbb   : > { %1089 = vmatprep.subr.mxu1 %v1136_v2  ;;  %868 = vmatprep.mubr.f32.mxu0 %v1136_v2  ;;  %v423_v31 = vpop.permute.xlu0 %422 }
  0xbc   : > { %1099 = vmatprep.mubr.msk.f32.mxu1 %vm1145_vm0, %v1136_v2 }
 0x17a   : > { %v576_v33 = vpop.f32.mrf.mxu1  ;;  %v505_v34 = vpop.f32.mrf.mxu0 }
 0x17b   : > { %v506_v35 = vadd.f32 %v505_v34, %v423_v31  ;;  %v577_v37 = vadd.f32 %v576_v33, %v423_v31 }
 0x17c   : > { %v1088_v39 = vpop.f32.mrf.mxu1  ;;  %v507_v6 = vpop.f32.mrf.mxu0 }
 0x17d   : > { %v596_v40 = vmul.f32 %v1343_v32, %v506_v35  ;;  %v508_v41 = vadd.f32 %v507_v6, %v423_v31  ;;  %v598_v43 = vmul.f32 %v1347_v38, %v577_v37 }
 0x17f   : > { %v597_v42 = vmul.f32 %v1345_v36, %v508_v41  ;;  %v599_v44 = vsel %vm429_vm4, %v596_v40, 0.0  ;;  %v602_v47 = vsel %vm429_vm4, %v598_v43, 0.0 }
 0x181   : > { %v600_v45 = vsel %vm429_vm4, %v597_v42, 0.0 }
 0x182   : > { %v601_v46 = vadd.f32 %v600_v45, %v599_v44 }
 0x184   : > { %v603_v48 = vadd.f32 %v602_v47, %v601_v46 }
 0x186   : > { %604 = vadd.xlane.f32.xlu1 %v603_v48 }
 0x20f   : > { %v605_v49 = vpop.xlane.xlu1 %604 }
 0x210   : > { %v606_v50 = vmul.f32 0.00390625, %v605_v49 }
 0x212   : > { %v607_v51 = vsub.f32 %v506_v35, %v606_v50  ;;  %v608_v52 = vsub.f32 %v508_v41, %v606_v50  ;;  %v609_v53 = vsub.f32 %v577_v37, %v606_v50 }
 0x214   : > { %v610_v54 = vmul.f32 %v607_v51, %v607_v51  ;;  %v611_v55 = vmul.f32 %v608_v52, %v608_v52  ;;  %v612_v56 = vmul.f32 %v609_v53, %v609_v53 }
 0x216   : > { %v613_v57 = vmul.f32 %v610_v54, %v1343_v32  ;;  %v614_v58 = vmul.f32 %v611_v55, %v1345_v36  ;;  %v615_v59 = vmul.f32 %v612_v56, %v1347_v38 }
 0x218   : > { %v616_v60 = vsel %vm429_vm4, %v613_v57, 0.0  ;;  %v617_v61 = vsel %vm429_vm4, %v614_v58, 0.0  ;;  %v619_v63 = vsel %vm429_vm4, %v615_v59, 0.0 }
 0x219   : > { %v618_v62 = vadd.f32 %v617_v61, %v616_v60 }
 0x21b   : > { %v620_v4 = vadd.f32 %v619_v63, %v618_v62 }
 0x21d   : > { %621 = vadd.xlane.f32.xlu0 %v620_v4 }
 0x2a6   : > { %v622_v5 = vpop.xlane.xlu0 %621 }
 0x2a7   : > { %v623_v8 = vmul.f32 0.00390625, %v622_v5 }
 0x2a9   : > { %v624_v9 = vadd.f32 1e-05, %v623_v8 }
 0x2ab   : > { %1124 = vrsqrt.f32 %v624_v9 }
 0x2b8   : > { %v1125_v10 = vpop.eup %1124 }
 0x2b9   : > { %v626_v11 = vmul.f32 %v1125_v10, %v607_v51  ;;  %v627_v12 = vmul.f32 %v1125_v10, %v608_v52  ;;  %v628_v13 = vmul.f32 %v1125_v10, %v609_v53 }
 0x2bb   : > { %v629_v14 = vmax.f32 %v626_v11, 0.0  ;;  %v630_v15 = vmax.f32 %v627_v12, 0.0  ;;  %v631_v16 = vmax.f32 %v628_v13, 0.0 }
 0x2bd   : > { %v632_v17 = vmul.f32 %v629_v14, %v1343_v32  ;;  %v633_v18 = vmul.f32 %v630_v15, %v1345_v36  ;;  %v634_v19 = vmul.f32 %v631_v16, %v1347_v38 }
 0x2bf   : > { %701 = vst [vmem:[#allocation2 + $0x8] sm:$0xf] %v632_v17  ;;  %702 = vst [vmem:[#allocation2 + $0x48] sm:$0xf] %v633_v18  ;;  %741 = vrot.lane.b32.xlu0 %v634_v19, %s1138_s28  ;;  %739 = vrot.lane.b32.xlu1 %v633_v18, %s1138_s28 }
 0x2c0   : > { %703 = vst [vmem:[#allocation2 + $0x40] sm:$0xf] %v634_v19 }
 0x2c3   : > { %760 = vrot.lane.b32.xlu1 %v633_v18, %s1137_s27  ;;  %737 = vrot.lane.b32.xlu0 %v632_v17, %s1138_s28 }
 0x2c7   : > { %762 = vrot.lane.b32.xlu1 %v634_v19, %s1137_s27  ;;  %706 = vrot.lane.b32.xlu0 %v633_v18, %s1139_s29 }
 0x2cb   : > { %758 = vrot.lane.b32.xlu1 %v632_v17, %s1137_s27  ;;  %727 = vrot.lane.b32.xlu0 %v633_v18, %s1140_s30 }
 0x2cf   : > { %708 = vrot.lane.b32.xlu1 %v634_v19, %s1139_s29  ;;  %704 = vrot.lane.b32.xlu0 %v632_v17, %s1139_s29 }
 0x2d3   : > { %729 = vrot.lane.b32.xlu1 %v634_v19, %s1140_s30  ;;  %680 = vrot.lane.b32.xlu0 %v632_v17, %s1141_s7 }
 0x2d7   : > { %725 = vrot.lane.b32.xlu1 %v632_v17, %s1140_s30  ;;  %684 = vrot.lane.b32.xlu0 %v634_v19, %s1141_s7 }
 0x2db   : > { %682 = vrot.lane.b32.xlu1 %v633_v18, %s1141_s7  ;;  %649 = vrot.lane.b32.xlu0 %v633_v18, %s1142_s8 }
 0x2df   : > { %647 = vrot.lane.b32.xlu1 %v632_v17, %s1142_s8  ;;  %670 = vrot.lane.b32.xlu0 %v633_v18, %s1143_s9 }
 0x2e3   : > { %668 = vrot.lane.b32.xlu1 %v632_v17, %s1143_s9  ;;  %672 = vrot.lane.b32.xlu0 %v634_v19, %s1143_s9 }
 0x2e7   : > { %651 = vrot.lane.b32.xlu1 %v634_v19, %s1142_s8  ;;  %637 = vrot.lane.b32.xlu0 %v633_v18, %s1144_s10 }
 0x2eb   : > { %635 = vrot.lane.b32.xlu1 %v632_v17, %s1144_s10  ;;  %789 = vperm.xlu0 %1122, %v786_v20  }
 0x2ef   : > { %639 = vrot.lane.b32.xlu1 %v634_v19, %s1144_s10 }
 0x331   : > { %v742_v21 = vpop.permute.xlu0 %741  ;;  %v740_v22 = vpop.permute.xlu1 %739 }
 0x332   : > { %v743_v23 = vsel %vm374_vm2, %v740_v22, %v742_v21 }
 0x333   : > { %v750_v24 = vrot.slane %v743_v23, 4 }
 0x335   : > { %756 = vst [vmem:[#allocation2 + $0x10] sm:$0xf0] %v750_v24  ;;  %v761_v25 = vpop.permute.xlu1 %760  ;;  %v738_v26 = vpop.permute.xlu0 %737 }
 0x336   : > { %v744_v27 = vsel %vm374_vm2, %v738_v26, %v740_v22  ;;  %v745_v28 = vsel %vm374_vm2, %v742_v21, %v738_v26 }
 0x337   : > { %v749_v29 = vrot.slane %v744_v27, 4  ;;  %v751_v30 = vrot.slane %v745_v28, 4 }
 0x339   : > { %755 = vst [vmem:[#allocation2 + $0x20] sm:$0xf0] %v749_v29  ;;  %757 = vst [vmem:[#allocation2 + $0x38] sm:$0xf0] %v751_v30  ;;  %v763_v31 = vpop.permute.xlu1 %762  ;;  %v707_v33 = vpop.permute.xlu0 %706 }
 0x33a   : > { %v764_v34 = vsel %vm396_vm1, %v761_v25, %v763_v31 }
 0x33b   : > { %768 = vst [vmem:[#allocation2 + $0x70] sm:$0xf] %v764_v34 }
 0x33d   : > { %v759_v35 = vpop.permute.xlu1 %758  ;;  %v728_v37 = vpop.permute.xlu0 %727 }
 0x33e   : > { %v765_v39 = vsel %vm396_vm1, %v759_v35, %v761_v25  ;;  %v766_v6 = vsel %vm396_vm1, %v763_v31, %v759_v35 }
 0x33f   : > { %767 = vst [vmem:[#allocation2 + $0x60] sm:$0xf] %v765_v39  ;;  %769 = vst [vmem:[#allocation2 + $0x28] sm:$0xf] %v766_v6 }
 0x341   : > { %v709_v40 = vpop.permute.xlu1 %708  ;;  %v705_v41 = vpop.permute.xlu0 %704 }
 0x342   : > { %v710_v42 = vsel %vm339_vm3, %v707_v33, %v709_v40  ;;  %v711_v43 = vsel %vm339_vm3, %v705_v41, %v707_v33  ;;  %v712_v44 = vsel %vm339_vm3, %v709_v40, %v705_v41  ;;  %v784_v45 = vld [vmem:[#allocation2 + $0x70] sm:$0xf]  ;;  %v770_v40 = vld [vmem:[%s1481_s4] sm:$0xf] }
 0x343   : > { %v717_v46 = vrot.slane %v710_v42, 4  ;;  %v716_v47 = vrot.slane %v711_v43, 4  ;;  %v718_v48 = vrot.slane %v712_v44, 4  ;;  %1057 = vmatprep.subr.msk.mxu0 %vm429_vm4, %v784_v45 }
 0x345   : > { %723 = vst [vmem:[#allocation2 + $0x48] sm:$0xf0] %v717_v46  ;;  %722 = vst [vmem:[#allocation2 + $0x8] sm:$0xf0] %v716_v47  ;;  %v730_v49 = vpop.permute.xlu1 %729  ;;  %v681_v50 = vpop.permute.xlu0 %680 }
 0x346   : > { %724 = vst [vmem:[#allocation2 + $0x40] sm:$0xf0] %v718_v48  ;;  %v731_v51 = vsel %vm361_vm5, %v728_v37, %v730_v49  ;;  %v783_v52 = vld [vmem:[#allocation2 + $0x60] sm:$0xf]  ;;  %v785_v53 = vld [vmem:[#allocation2 + $0x28] sm:$0xf] }
 0x347   : > { %735 = vst [vmem:[#allocation2 + $0x10] sm:$0xf] %v731_v51  ;;  %1058 = vmatpush1.msk.msra.mxu0 %vm429_vm4, %v783_v52  ;;  %1090 = vmatpush3.msk.msra.mxu1 %vm429_vm4, %v785_v53 }
 0x348   : > { %1091 = vmatprep.subr.mxu1 %v1136_v2 }
 0x349   : > { %v726_v54 = vpop.permute.xlu1 %725  ;;  %v685_v55 = vpop.permute.xlu0 %684 }
 0x34a   : > { %v732_v56 = vsel %vm361_vm5, %v726_v54, %v728_v37  ;;  %v733_v57 = vsel %vm361_vm5, %v730_v49, %v726_v54  ;;  %v688_v58 = vsel %vm314_vm6, %v685_v55, %v681_v50 }
 0x34b   : > { %734 = vst [vmem:[#allocation2 + $0x20] sm:$0xf] %v732_v56  ;;  %736 = vst [vmem:[#allocation2 + $0x38] sm:$0xf] %v733_v57  ;;  %v692_v59 = vrot.slane %v688_v58, 4 }
 0x34c   : > { %v778_v15 = vld [vmem:[#allocation2 + $0x48] sm:$0xff] }
 0x34d   : > { %698 = vst [vmem:[#allocation2 + $0x18] sm:$0xf0] %v692_v59  ;;  %v683_v60 = vpop.permute.xlu1 %682  ;;  %v650_v61 = vpop.permute.xlu0 %649  ;;  %v779_v16 = vld [vmem:[#allocation2 + $0x40] sm:$0xff]  ;;  %v777_v17 = vld [vmem:[#allocation2 + $0x8] sm:$0xff] }
 0x34e   : > { %v686_v62 = vsel %vm314_vm6, %v683_v60, %v685_v55  ;;  %v687_v63 = vsel %vm314_vm6, %v681_v50, %v683_v60  ;;  %v781_v4 = vld [vmem:[#allocation2 + $0x10] sm:$0xff] }
 0x34f   : > { %v693_v5 = vrot.slane %v687_v63, 4  ;;  %v694_v8 = vrot.slane %v686_v62, 4  ;;  %828 = vmatprep.subr.mxu0 %v781_v4 }
 0x351   : > { %699 = vst [vmem:[#allocation2 + $0x50] sm:$0xf0] %v693_v5  ;;  %700 = vst [vmem:[#allocation2 + $0x68] sm:$0xf0] %v694_v8  ;;  %v648_v9 = vpop.permute.xlu1 %647  ;;  %v671_v10 = vpop.permute.xlu0 %670 }
 0x352   : > { %v654_v11 = vsel %vm279_vm7, %v648_v9, %v650_v61  ;;  %v780_v12 = vld [vmem:[#allocation2 + $0x20] sm:$0xff]  ;;  %v782_v13 = vld [vmem:[#allocation2 + $0x38] sm:$0xff] }
 0x353   : > { %v660_v14 = vrot.slane %v654_v11, 4  ;;  %829 = vmatpush1.msra.mxu0 %v780_v12  ;;  %1092 = vmatpush3.msra.mxu1 %v782_v13 }
 0x354   : > { %830 = vmatprep.subr.mxu0 %v778_v15  ;;  %1093 = vmatprep.subr.mxu1 %v1136_v2 }
 0x355   : > { %666 = vst [vmem:[#allocation2] sm:$0xf0] %v660_v14  ;;  %v669_v18 = vpop.permute.xlu1 %668  ;;  %1094 = vmatpush3.msra.mxu1 %v779_v16  ;;  %v673_v19 = vpop.permute.xlu0 %672  ;;  %831 = vmatpush1.msra.mxu0 %v777_v17 }
 0x356   : > { %v675_v20 = vsel %vm301_vm8, %v669_v18, %v671_v10  ;;  %v674_v21 = vsel %vm301_vm8, %v671_v10, %v673_v19  ;;  %v676_v22 = vsel %vm301_vm8, %v673_v19, %v669_v18  ;;  %1095 = vmatprep.subr.mxu1 %v1136_v2 }
 0x357   : > { %678 = vst [vmem:[#allocation2 + $0x50] sm:$0xf] %v675_v20  ;;  %677 = vst [vmem:[#allocation2 + $0x18] sm:$0xf] %v676_v22 }
 0x358   : > { %679 = vst [vmem:[#allocation2 + $0x68] sm:$0xf] %v674_v21 }
 0x359   : > { %v652_v23 = vpop.permute.xlu1 %651  ;;  %v638_v28 = vpop.permute.xlu0 %637 }
 0x35a   : > { %v653_v24 = vsel %vm279_vm7, %v650_v61, %v652_v23  ;;  %v655_v25 = vsel %vm279_vm7, %v652_v23, %v648_v9 }
 0x35b   : > { %v659_v26 = vrot.slane %v655_v25, 4  ;;  %v661_v27 = vrot.slane %v653_v24, 4 }
 0x35d   : > { %665 = vst [vmem:[#allocation2 + $0x30] sm:$0xf0] %v659_v26  ;;  %667 = vst [vmem:[#allocation2 + $0x58] sm:$0xf0] %v661_v27  ;;  %v636_v29 = vpop.permute.xlu1 %635 }
 0x35e   : > { %v642_v30 = vsel %vm266_vm9, %v636_v29, %v638_v28  ;;  %v775_v31 = vld [vmem:[#allocation2 + $0x50] sm:$0xff]  ;;  %v774_v34 = vld [vmem:[#allocation2 + $0x18] sm:$0xff] }
 0x35f   : > { %v776_v33 = vld [vmem:[#allocation2 + $0x68] sm:$0xff]  ;;  %645 = vst [vmem:[#allocation2] sm:$0xf] %v642_v30  ;;  %832 = vmatprep.subr.mxu0 %v775_v31 }
 0x360   : > { %1096 = vmatpush3.msra.mxu1 %v776_v33  ;;  %833 = vmatpush1.msra.mxu0 %v774_v34 }
 0x361   : > { %1097 = vmatprep.subr.mxu1 %v1136_v2  ;;  %v640_v35 = vpop.permute.xlu1 %639 }
 0x362   : > { %v641_v37 = vsel %vm266_vm9, %v638_v28, %v640_v35  ;;  %v643_v39 = vsel %vm266_vm9, %v640_v35, %v636_v29 }
 0x363   : > { %644 = vst [vmem:[#allocation2 + $0x30] sm:$0xf] %v643_v39  ;;  %646 = vst [vmem:[#allocation2 + $0x58] sm:$0xf] %v641_v37 }
 0x366   : > { %v772_v6 = vld [vmem:[#allocation2] sm:$0xff]  ;;  %v790_v2 = vpop.permute.xlu0 %789 }
 0x367   : > { %834 = vmatprep.subr.mxu0 %v772_v6 }
 0x36a   : > { %v771_v41 = vld [vmem:[#allocation2 + $0x30] sm:$0xff]  ;;  %v773_v42 = vld [vmem:[#allocation2 + $0x58] sm:$0xff] }
 0x36b   : > { %835 = vmatpush1.msra.mxu0 %v771_v41  ;;  %1098 = vmatpush3.msra.mxu1 %v773_v42 }
 0x36c   : > { %1059 = vmatmul.mubr.msk.f32.vlgmr.msra.gmra.mxu0 %vm425_vm10, %v770_v40  ;;  %1100 = vmatmul.mubr.msk.f32.vlgmr.msra.gmra.mxu1 %vm425_vm10, %v770_v40 }
 0x42c   : > { %v870_v43 = vpop.f32.mrf.mxu0  ;;  %v941_v7 = vpop.f32.mrf.mxu1 }
 0x42d   : > { %v871_v44 = vadd.f32 %v870_v43, %v790_v2  ;;  %v942_v45 = vadd.f32 %v941_v7, %v790_v2 }
 0x42e   : > { %v872_v46 = vpop.f32.mrf.mxu0  ;;  %v1101_v47 = vpop.f32.mrf.mxu1 }
 0x42f   : > { %v945_v48 = vmul.f32 %v871_v44, %v1343_v32  ;;  %v873_v49 = vadd.f32 %v872_v46, %v790_v2  ;;  %v947_v50 = vmul.f32 %v942_v45, %v1347_v38 }
 0x431   : > { %v946_v51 = vmul.f32 %v873_v49, %v1345_v36  ;;  %v948_v52 = vsel %vm429_vm4, %v945_v48, 0.0  ;;  %v951_v55 = vsel %vm429_vm4, %v947_v50, 0.0 }
 0x433   : > { %v949_v53 = vsel %vm429_vm4, %v946_v51, 0.0 }
 0x434   : > { %v950_v54 = vadd.f32 %v949_v53, %v948_v52 }
 0x436   : > { %v952_v56 = vadd.f32 %v951_v55, %v950_v54 }
 0x438   : > { %953 = vadd.xlane.f32.xlu1 %v952_v56 }
 0x4c1   : > { %v954_v57 = vpop.xlane.xlu1 %953 }
 0x4c2   : > { %v955_v58 = vmul.f32 0.00390625, %v954_v57 }
 0x4c4   : > { %v956_v59 = vsub.f32 %v871_v44, %v955_v58  ;;  %v957_v60 = vsub.f32 %v873_v49, %v955_v58  ;;  %v958_v61 = vsub.f32 %v942_v45, %v955_v58 }
 0x4c6   : > { %v959_v62 = vmul.f32 %v956_v59, %v956_v59  ;;  %v960_v63 = vmul.f32 %v957_v60, %v957_v60  ;;  %v961_v4 = vmul.f32 %v958_v61, %v958_v61 }
 0x4c8   : > { %v962_v5 = vmul.f32 %v959_v62, %v1343_v32  ;;  %v963_v8 = vmul.f32 %v960_v63, %v1345_v36  ;;  %v964_v9 = vmul.f32 %v961_v4, %v1347_v38 }
 0x4ca   : > { %v965_v10 = vsel %vm429_vm4, %v962_v5, 0.0  ;;  %v966_v11 = vsel %vm429_vm4, %v963_v8, 0.0  ;;  %v968_v13 = vsel %vm429_vm4, %v964_v9, 0.0 }
 0x4cb   : > { %v967_v12 = vadd.f32 %v966_v11, %v965_v10 }
 0x4cd   : > { %v969_v14 = vadd.f32 %v968_v13, %v967_v12 }
 0x4cf   : > { %970 = vadd.xlane.f32.xlu0 %v969_v14 }
 0x558   : > { %v971_v15 = vpop.xlane.xlu0 %970 }
 0x559   : > { %v972_v16 = vmul.f32 0.00390625, %v971_v15 }
 0x55b   : > { %v973_v17 = vadd.f32 1e-05, %v972_v16 }
 0x55d   : > { %1126 = vrsqrt.f32 %v973_v17 }
 0x56a   : > { %v1127_v18 = vpop.eup %1126 }
 0x56b   : > { %v975_v19 = vmul.f32 %v1127_v18, %v956_v59  ;;  %v976_v20 = vmul.f32 %v1127_v18, %v957_v60  ;;  %v977_v21 = vmul.f32 %v1127_v18, %v958_v61 }
 0x56d   : > { %v978_v22 = vmul.f32 %v975_v19, %v1343_v32  ;;  %v979_v23 = vmul.f32 %v976_v20, %v1345_v36  ;;  %v980_v24 = vmul.f32 %v977_v21, %v1347_v38 }
 0x56f   : > { %v981_v25 = vadd.f32 %v978_v22, %v1200_v1  ;;  %v982_v26 = vadd.f32 %v979_v23, %v1212_v3  ;;  %v983_v27 = vadd.f32 %v980_v24, %v1198_v0 }
 0x571   : > { %v986_v28 = vcombine.low %v981_v25, %v982_v26  ;;  %989 = vst [vmem:[%s251_s26 + $0x8] sm:$0xf] %v983_v27 }
 0x573   : > { %988 = vst [vmem:[%s251_s26] sm:$0xff] %v986_v28 }
 0x574 PF: > { %s16_s21 = sadd.s32 1, %s1134_s21  }
 0x575   : > { %p13_p4 = scmp.ge.s32.totalorder %s16_s21, 4  }
 0x577   :  { %15 = sbr.rel (!%p13_p4) target bundleno = 1 (0x1), region = 74 }

</bundles_post_ra>
